<compile_context>
chip_gen: v5e
topology: v5e:2x2
jax: 0.10.0
libtpu: 0.0.40
codegen_flags: <defaults>
</compile_context>

<pallas_src>
import functools

import jax
import jax.numpy as jnp
from jax.experimental import pallas as pl
from jax.experimental.pallas import tpu as pltpu


def _cdiv(a, b):
    return (a + b - 1) // b


def _round_up(x, m):
    return (x + m - 1) // m * m


def _nll_kernel(pred_ref, tgt_ref, w_ref, num_ref, den_ref, *, n_rows):
    # pred_ref: (TB, TC) log-prob tile in native dtype
    # tgt_ref : (TB, 1)  int32 target tile
    # w_ref   : (1, TC)  f32 per-class weights (ones when module weight is None)
    # num_ref : (1, TC)  resident accumulator: per-lane sum of weight[t]*pred[i,t]
    # den_ref : (1, TC)  resident accumulator: per-lane sum of weight[t]
    p = pl.program_id(0)          # core-split ("parallel") axis
    j = pl.program_id(1)          # class-tile axis
    i = pl.program_id(2)          # row-tile (reduction) axis, last by convention

    tb, tc = pred_ref.shape

    @pl.when(i == 0)
    def _():
        num_ref[...] = jnp.zeros_like(num_ref)
        den_ref[...] = jnp.zeros_like(den_ref)

    pred = pred_ref[...].astype(jnp.float32)      # upcast per-tile on the VPU
    w = w_ref[...]                                # (1, TC) f32
    tgt = tgt_ref[...]                            # (TB, 1) int32

    # Logical (un-clamped) start row / start class of this tile.
    row_start = (p * pl.num_programs(2) + i) * tb
    class_start = j * tc

    row_ids = row_start + jax.lax.broadcasted_iota(jnp.int32, (tb, 1), 0)
    class_ids = class_start + jax.lax.broadcasted_iota(jnp.int32, (tb, tc), 1)

    # One-hot target select, gated on the real row index so tail blocks (and
    # clamped out-of-range blocks) that hold garbage pred/target rows
    # contribute exactly zero.  jnp.where keeps NaN/Inf garbage out.
    hit = (tgt == class_ids) & (row_ids < n_rows)                  # (TB, TC)

    num_ref[...] += jnp.sum(jnp.where(hit, pred * w, 0.0), axis=0, keepdims=True)
    den_ref[...] += jnp.sum(jnp.where(hit, w, 0.0), axis=0, keepdims=True)


def _choose_tiles(n, c, itemsize, tile_rows=None):
    # Class tile: whole class dim when small (block == full dim is always
    # legal), otherwise a 128-aligned slab so huge-vocab tiles still fit VMEM.
    tc = c if c <= 2048 else 2048
    # Row tile: fill ~32 MiB of double-buffered pred stream, 8-aligned, capped.
    budget = 32 * 1024 * 1024
    tb = budget // (2 * tc * itemsize)
    tb = min(tb, 4096, _round_up(n, 8))
    tb = max(8, (tb // 8) * 8)
    if tile_rows is not None:                     # test/tuning override
        tb = max(8, (min(tile_rows, _round_up(n, 8)) // 8) * 8)
    return tb, tc


def unmasked_weighted_nll_loss(pred, target, weight=None, *, tile_rows=None,
                               num_splits=2):
    """
    pred   : (N, C) float log-probabilities (f32 or bf16; streamed as-is)
    target : (N,)   int class indices
    weight : optional (C,) per-class weights
    Returns a scalar f32 loss matching UnMaskedWeightedNLLLoss.forward.
    """
    n, c = pred.shape
    itemsize = jnp.dtype(pred.dtype).itemsize
    tb, tc = _choose_tiles(n, c, itemsize, tile_rows)

    n_row_blocks = _cdiv(n, tb)
    n_class_blocks = _cdiv(c, tc)
    n_split = num_splits if n_row_blocks >= num_splits else 1
    rpt = _cdiv(n_row_blocks, n_split)            # row blocks per split

    tgt2d = target.astype(jnp.int32).reshape(n, 1)        # metadata-only reshape
    w2d = (jnp.ones((c,), jnp.float32) if weight is None
           else jnp.asarray(weight, jnp.float32)).reshape(1, c)

    def row_block(p, i):
        # Clamp so the DMA never addresses past the array; the kernel masks on
        # the logical (un-clamped) row index, so clamped blocks contribute 0.
        return jnp.minimum(p * rpt + i, n_row_blocks - 1)

    grid_spec = pltpu.PrefetchScalarGridSpec(
        num_scalar_prefetch=0,
        grid=(n_split, n_class_blocks, rpt),
        in_specs=[
            pl.BlockSpec((tb, tc), lambda p, j, i: (row_block(p, i), j)),   # pred
            pl.BlockSpec((tb, 1), lambda p, j, i: (row_block(p, i), 0)),    # target
            pl.BlockSpec((1, tc), lambda p, j, i: (0, j)),                  # weights
        ],
        out_specs=[
            pl.BlockSpec((pl.Squeezed(), 1, tc), lambda p, j, i: (p, 0, j)),
            pl.BlockSpec((pl.Squeezed(), 1, tc), lambda p, j, i: (p, 0, j)),
        ],
    )

    cost = pl.CostEstimate(
        flops=4 * n * c,
        transcendentals=0,
        bytes_accessed=(n * c * itemsize            # pred, read once
                        + n_class_blocks * n * 4    # target, re-read per class tile
                        + c * 4                     # weights
                        + 2 * n_split * c * 4),     # accumulator outputs
    )

    num, den = pl.pallas_call(
        functools.partial(_nll_kernel, n_rows=n),
        out_shape=(
            jax.ShapeDtypeStruct((n_split, 1, c), jnp.float32),
            jax.ShapeDtypeStruct((n_split, 1, c), jnp.float32),
        ),
        grid_spec=grid_spec,
        compiler_params=pltpu.CompilerParams(
            dimension_semantics=("parallel", "arbitrary", "arbitrary"),
            vmem_limit_bytes=48 * 1024 * 1024,
        ),
        cost_estimate=cost,
    )(pred, tgt2d, w2d)

    # Final cross-lane / cross-split reduction, negation and (weighted) divide
    # are a handful of scalar-ish ops on tiny arrays -> do them in the wrapper.
    loss = -jnp.sum(num)
    if weight is not None:
        loss = loss / jnp.sum(den)
    return loss


def _reference(pred, target, weight=None):
    # Pure-JAX reference mirroring nn.NLLLoss(weight, reduction='sum') plus the
    # module's division by sum(weight[target]) when a weight is given.
    pred = pred.astype(jnp.float32)
    picked = jnp.take_along_axis(pred, target[:, None], axis=1)[:, 0]
    if weight is None:
        return -jnp.sum(picked)
    wt = weight.astype(jnp.float32)[target]
    return -jnp.sum(wt * picked) / jnp.sum(wt)


if __name__ == "__main__":
    # Small deterministic shapes: batch=2, seq_len=8 -> N=16 rows, 6 classes.
    batch, seq_len, n_classes = 2, 8, 6
    n = batch * seq_len

    key = jax.random.PRNGKey(0)
    k_logits, k_tgt, k_w, k_logits2, k_tgt2 = jax.random.split(key, 5)

    logits = jax.random.normal(k_logits, (n, n_classes), dtype=jnp.float32)
    pred = jax.nn.log_softmax(logits, axis=-1)          # NLLLoss expects log-probs
    target = jax.random.randint(k_tgt, (n,), 0, n_classes, dtype=jnp.int32)
    weight = jax.random.uniform(k_w, (n_classes,), dtype=jnp.float32,
                                minval=0.5, maxval=2.0)

    loss_u = unmasked_weighted_nll_loss(pred, target, weight=None)
    loss_w = unmasked_weighted_nll_loss(pred, target, weight=weight)
    jax.block_until_ready((loss_u, loss_w))

    assert jnp.allclose(loss_u, _reference(pred, target, None),
                        atol=1e-4, rtol=1e-4), (loss_u, _reference(pred, target, None))
    assert jnp.allclose(loss_w, _reference(pred, target, weight),
                        atol=1e-4, rtol=1e-4), (loss_w, _reference(pred, target, weight))

    # Second check: ragged N (not a multiple of the row tile), multiple row
    # blocks, the core-split axis, and native bf16 streaming of pred.
    n2 = 37
    logits2 = jax.random.normal(k_logits2, (n2, n_classes), dtype=jnp.float32)
    pred2 = jax.nn.log_softmax(logits2, axis=-1).astype(jnp.bfloat16)
    target2 = jax.random.randint(k_tgt2, (n2,), 0, n_classes, dtype=jnp.int32)

    loss2_u = unmasked_weighted_nll_loss(pred2, target2, weight=None, tile_rows=8)
    loss2_w = unmasked_weighted_nll_loss(pred2, target2, weight=weight, tile_rows=8)
    jax.block_until_ready((loss2_u, loss2_w))

    assert jnp.allclose(loss2_u, _reference(pred2, target2, None),
                        atol=2e-3, rtol=2e-3), (loss2_u, _reference(pred2, target2, None))
    assert jnp.allclose(loss2_w, _reference(pred2, target2, weight),
                        atol=2e-3, rtol=2e-3), (loss2_w, _reference(pred2, target2, weight))

    print("KERNEL_OK")
</pallas_src>

<mosaic_0001>
module attributes {stable_mosaic.version = 11 : i64} {
  func.func @_nll_kernel(%arg0: i32, %arg1: i32, %arg2: i32, %arg3: memref<16x6xf32, #tpu.memory_space<vmem>>, %arg4: memref<16x1xi32, #tpu.memory_space<vmem>>, %arg5: memref<1x6xf32, #tpu.memory_space<vmem>>, %arg6: memref<1x1x6xf32, #tpu.memory_space<vmem>>, %arg7: memref<1x1x6xf32, #tpu.memory_space<vmem>>) attributes {dimension_semantics = [#tpu.dimension_semantics<parallel>, #tpu.dimension_semantics<arbitrary>, #tpu.dimension_semantics<arbitrary>], iteration_bounds = array<i64: 1, 1, 1>, scalar_prefetch = 0 : i64, scratch_operands = 0 : i64, tpu.core_type = #tpu.core_type<tc>, window_params = [{transform_indices = @transform_0, window_bounds = array<i64: 16, 6>}, {transform_indices = @transform_1, window_bounds = array<i64: 16, 1>}, {transform_indices = @transform_2, window_bounds = array<i64: 1, 6>}, {transform_indices = @transform_3, window_bounds = array<i64: 1, 1, 6>}, {transform_indices = @transform_4, window_bounds = array<i64: 1, 1, 6>}]} {
    %c0_i32 = arith.constant 0 : i32
    %0 = arith.cmpi eq, %arg2, %c0_i32 : i32
    %1 = arith.extui %0 : i1 to i32
    %c0_i32_0 = arith.constant 0 : i32
    %2 = arith.cmpi ne, %1, %c0_i32_0 : i32
    scf.if %2 {
      %cst_22 = arith.constant 0.000000e+00 : f32
      %46 = vector.broadcast %cst_22 : f32 to vector<1x6xf32>
      %c0_23 = arith.constant 0 : index
      %c0_24 = arith.constant 0 : index
      %c0_25 = arith.constant 0 : index
      %47 = vector.load %arg6[%c0_23, %c0_24, %c0_25] : memref<1x1x6xf32, #tpu.memory_space<vmem>>, vector<1x1x6xf32>
      %48 = vector.shape_cast %47 : vector<1x1x6xf32> to vector<1x6xf32>
      %49 = vector.shape_cast %46 : vector<1x6xf32> to vector<1x1x6xf32>
      tpu.vector_store %arg6[%c0_23, %c0_24, %c0_25], %49 {strides = array<i32>} : memref<1x1x6xf32, #tpu.memory_space<vmem>>, vector<1x1x6xf32>,
      %cst_26 = arith.constant 0.000000e+00 : f32
      %50 = vector.broadcast %cst_26 : f32 to vector<1x6xf32>
      %c0_27 = arith.constant 0 : index
      %c0_28 = arith.constant 0 : index
      %c0_29 = arith.constant 0 : index
      %51 = vector.load %arg7[%c0_27, %c0_28, %c0_29] : memref<1x1x6xf32, #tpu.memory_space<vmem>>, vector<1x1x6xf32>
      %52 = vector.shape_cast %51 : vector<1x1x6xf32> to vector<1x6xf32>
      %53 = vector.shape_cast %50 : vector<1x6xf32> to vector<1x1x6xf32>
      tpu.vector_store %arg7[%c0_27, %c0_28, %c0_29], %53 {strides = array<i32>} : memref<1x1x6xf32, #tpu.memory_space<vmem>>, vector<1x1x6xf32>,
    } else {
    }
    %c0 = arith.constant 0 : index
    %c0_1 = arith.constant 0 : index
    %3 = vector.load %arg3[%c0, %c0_1] : memref<16x6xf32, #tpu.memory_space<vmem>>, vector<16x6xf32>
    %c0_2 = arith.constant 0 : index
    %c0_3 = arith.constant 0 : index
    %4 = vector.load %arg5[%c0_2, %c0_3] : memref<1x6xf32, #tpu.memory_space<vmem>>, vector<1x6xf32>
    %c0_4 = arith.constant 0 : index
    %c0_5 = arith.constant 0 : index
    %5 = vector.load %arg4[%c0_4, %c0_5] : memref<16x1xi32, #tpu.memory_space<vmem>>, vector<16x1xi32>
    %c1_i32 = arith.constant 1 : i32
    %6 = arith.muli %arg0, %c1_i32 : i32
    %7 = arith.addi %6, %arg2 : i32
    %c16_i32 = arith.constant 16 : i32
    %8 = arith.muli %7, %c16_i32 : i32
    %c6_i32 = arith.constant 6 : i32
    %9 = arith.muli %arg1, %c6_i32 : i32
    %10 = tpu.iota {dimensions = array<i32: 0>} : vector<16x1xi32>
    %11 = vector.broadcast %8 : i32 to vector<16x1xi32>
    %12 = arith.addi %11, %10 : vector<16x1xi32>
    %13 = tpu.iota {dimensions = array<i32: 1>} : vector<16x6xi32>
    %14 = vector.broadcast %9 : i32 to vector<16x6xi32>
    %15 = arith.addi %14, %13 : vector<16x6xi32>
    %16 = vector.broadcast %5 : vector<16x1xi32> to vector<16x6xi32>
    %17 = arith.cmpi eq, %16, %15 : vector<16x6xi32>
    %c16_i32_6 = arith.constant 16 : i32
    %18 = vector.broadcast %c16_i32_6 : i32 to vector<16x1xi32>
    %19 = arith.cmpi slt, %12, %18 : vector<16x1xi32>
    %20 = vector.broadcast %19 : vector<16x1xi1> to vector<16x6xi1>
    %21 = arith.andi %17, %20 : vector<16x6xi1>
    %c0_7 = arith.constant 0 : index
    %c0_8 = arith.constant 0 : index
    %c0_9 = arith.constant 0 : index
    %22 = vector.load %arg6[%c0_7, %c0_8, %c0_9] : memref<1x1x6xf32, #tpu.memory_space<vmem>>, vector<1x1x6xf32>
    %23 = vector.shape_cast %22 : vector<1x1x6xf32> to vector<1x6xf32>
    %24 = vector.broadcast %4 : vector<1x6xf32> to vector<16x6xf32>
    %25 = arith.mulf %3, %24 : vector<16x6xf32>
    %cst = arith.constant 0.000000e+00 : f32
    %26 = vector.broadcast %cst : f32 to vector<16x6xf32>
    %27 = arith.select %21, %25, %26 : vector<16x6xi1>, vector<16x6xf32>
    %cst_10 = arith.constant dense<0.000000e+00> : vector<6xf32>
    %28 = vector.multi_reduction <add>, %27, %cst_10 [0] : vector<16x6xf32> to vector<6xf32>
    %29 = vector.shape_cast %28 : vector<6xf32> to vector<1x6xf32>
    %30 = arith.addf %23, %29 : vector<1x6xf32>
    %c0_11 = arith.constant 0 : index
    %c0_12 = arith.constant 0 : index
    %c0_13 = arith.constant 0 : index
    %31 = vector.load %arg6[%c0_11, %c0_12, %c0_13] : memref<1x1x6xf32, #tpu.memory_space<vmem>>, vector<1x1x6xf32>
    %32 = vector.shape_cast %31 : vector<1x1x6xf32> to vector<1x6xf32>
    %33 = vector.shape_cast %30 : vector<1x6xf32> to vector<1x1x6xf32>
    tpu.vector_store %arg6[%c0_11, %c0_12, %c0_13], %33 {strides = array<i32>} : memref<1x1x6xf32, #tpu.memory_space<vmem>>, vector<1x1x6xf32>,
    %c0_14 = arith.constant 0 : index
    %c0_15 = arith.constant 0 : index
    %c0_16 = arith.constant 0 : index
    %34 = vector.load %arg7[%c0_14, %c0_15, %c0_16] : memref<1x1x6xf32, #tpu.memory_space<vmem>>, vector<1x1x6xf32>
    %35 = vector.shape_cast %34 : vector<1x1x6xf32> to vector<1x6xf32>
    %cst_17 = arith.constant 0.000000e+00 : f32
    %36 = vector.shape_cast %4 : vector<1x6xf32> to vector<1x6xf32>
    %37 = vector.broadcast %36 : vector<1x6xf32> to vector<16x6xf32>
    %38 = vector.broadcast %cst_17 : f32 to vector<16x6xf32>
    %39 = arith.select %21, %37, %38 : vector<16x6xi1>, vector<16x6xf32>
    %cst_18 = arith.constant dense<0.000000e+00> : vector<6xf32>
    %40 = vector.multi_reduction <add>, %39, %cst_18 [0] : vector<16x6xf32> to vector<6xf32>
    %41 = vector.shape_cast %40 : vector<6xf32> to vector<1x6xf32>
    %42 = arith.addf %35, %41 : vector<1x6xf32>
    %c0_19 = arith.constant 0 : index
    %c0_20 = arith.constant 0 : index
    %c0_21 = arith.constant 0 : index
    %43 = vector.load %arg7[%c0_19, %c0_20, %c0_21] : memref<1x1x6xf32, #tpu.memory_space<vmem>>, vector<1x1x6xf32>
    %44 = vector.shape_cast %43 : vector<1x1x6xf32> to vector<1x6xf32>
    %45 = vector.shape_cast %42 : vector<1x6xf32> to vector<1x1x6xf32>
    tpu.vector_store %arg7[%c0_19, %c0_20, %c0_21], %45 {strides = array<i32>} : memref<1x1x6xf32, #tpu.memory_space<vmem>>, vector<1x1x6xf32>,
    return
  }
  func.func @transform_0(%arg0: i32, %arg1: i32, %arg2: i32) -> (i32, i32) {
    %c1_i32 = arith.constant 1 : i32
    %0 = arith.muli %arg0, %c1_i32 : i32
    %1 = arith.addi %0, %arg2 : i32
    %c0_i32 = arith.constant 0 : i32
    %2 = arith.minsi %1, %c0_i32 : i32
    %c0_i32_0 = arith.constant 0 : i32
    return %2, %arg1 : i32, i32
  }
  func.func @transform_1(%arg0: i32, %arg1: i32, %arg2: i32) -> (i32, i32) {
    %c1_i32 = arith.constant 1 : i32
    %0 = arith.muli %arg0, %c1_i32 : i32
    %1 = arith.addi %0, %arg2 : i32
    %c0_i32 = arith.constant 0 : i32
    %2 = arith.minsi %1, %c0_i32 : i32
    %c0_i32_0 = arith.constant 0 : i32
    %c0_i32_1 = arith.constant 0 : i32
    return %2, %c0_i32_0 : i32, i32
  }
  func.func @transform_2(%arg0: i32, %arg1: i32, %arg2: i32) -> (i32, i32) {
    %c0_i32 = arith.constant 0 : i32
    %c0_i32_0 = arith.constant 0 : i32
    return %c0_i32, %arg1 : i32, i32
  }
  func.func @transform_3(%arg0: i32, %arg1: i32, %arg2: i32) -> (i32, i32, i32) {
    %c0_i32 = arith.constant 0 : i32
    %c0_i32_0 = arith.constant 0 : i32
    return %arg0, %c0_i32, %arg1 : i32, i32, i32
  }
  func.func @transform_4(%arg0: i32, %arg1: i32, %arg2: i32) -> (i32, i32, i32) {
    %c0_i32 = arith.constant 0 : i32
    %c0_i32_0 = arith.constant 0 : i32
    return %arg0, %c0_i32, %arg1 : i32, i32, i32
  }
}

</mosaic_0001>

<bundles_post_ra>
// kernel: tpu_custom_call.1
= control target key start
LH: loop header
LB: loop body
LE: loop exit
PB: predicated region body
PF: predicated region fallthrough
CT: control target
= control target key end

     0   :  { %10 = vsyncpa [#allocation3], 0  ;;  %v260_v1 = vmov 0   ;;  %s314_s0 = inlined_call_operand.vmem [shape: f32[16,6], index: 0, kind: input, shape index: {}]   ;;  %s315_s1 = inlined_call_operand.vmem [shape: s32[16,1], index: 1, kind: input, shape index: {}]   ;;  %s316_s2 = inlined_call_operand.vmem [shape: f32[1,6], index: 2, kind: input, shape index: {}]   ;;  %s317_s3 = inlined_call_operand.hbm [shape: f32[1,1,6], index: 3, kind: output, shape index: {0}]   ;;  %s318_s4 = inlined_call_operand.hbm [shape: f32[1,1,6], index: 4, kind: output, shape index: {1}]  }
   0x1   :  { %v92_v0 = vld [vmem:[%s315_s1] sm:$0xff]  ;;  %206 = vset.pattern.permute.xlu0 %v260_v1 }
   0x2   :  { %11 = vsyncpa [#allocation5], 0  ;;  %108 = vperm.xlu0 %206, %v92_v0   ;;  %v93_v2 = vld [vmem:[%s315_s1 + $0x8] sm:$0xff]  ;;  %vm86_vm0 = vcmask 40960   ;;  %v261_v3 = vmov 0.0   ;;  %v103_v4 = vlaneseq  ;;  %v89_v8 = vld [vmem:[%s314_s0] sm:$0xff] }
   0x3   :  { %87 = vst.msk [vmem:[#allocation2] sm:$0x1] %vm86_vm0, %v261_v3  ;;  %v207_v6 = vld [vmem:[%s316_s2] ss:$0 sm:$0xff]  ;;  %v90_v9 = vld [vmem:[%s314_s0 + $0x8] sm:$0xff]  ;;  %vm131_vm2 = vcmask 48128  }
   0x4   :  { %88 = vst.msk [vmem:[#allocation4] sm:$0x1] %vm86_vm0, %v261_v3  ;;  %v104_v7 = vand.u32 127, %v103_v4  ;;  %v127_v10 = vmul.f32 %v207_v6, %v89_v8  ;;  %v128_v11 = vmul.f32 %v207_v6, %v90_v9  ;;  %s262_s0 = smov [#allocation2]   ;;  %s165_s26 = sshll.u32 %s317_s3, 4  ;;  %s166_s26 = int_to_ptr.hbm [resolvable:$true] %s165_s26 }
   0x5   :  { %s163_s2 = sshll.u32 %s262_s0, 4  ;;  %s263_s27 = smov [#allocation4]   ;;  %s164_s2 = int_to_ptr.vmem [resolvable:$true] %s163_s2 }
   0x6   :  { %s174_s28 = sshll.u32 %s263_s27, 4  ;;  %s176_s5 = sshll.u32 %s318_s4, 4  ;;  %s175_s28 = int_to_ptr.vmem [resolvable:$true] %s174_s28  ;;  %s177_s5 = int_to_ptr.hbm [resolvable:$true] %s176_s5 }
   0xa   :  { %111 = vperm.xlu0 %206, %v93_v2   ;;  %v123_v33 = vld [vmem:[#allocation2] sm:$0x1] }
   0xb   :  { %v144_v34 = vld [vmem:[#allocation4] sm:$0x1] }
  0x74   :  { %v109_v5 = vpop.permute.xlu0 %108 }
  0x75   :  { %vm113_vm1 = vcmp.eq.s32.totalorder %v109_v5, %v104_v7 }
  0x76   :  { %v129_v12 = vsel %vm113_vm1, %v127_v10, 0.0  ;;  %v145_v13 = vsel %vm113_vm1, %v207_v6, 0.0 }
  0x77   :  { %v132_v17 = vsel %vm131_vm2, %v129_v12, 0.0  ;;  %v147_v18 = vsel %vm131_vm2, %v145_v13, 0.0 }
  0x7c   :  { %v112_v14 = vpop.permute.xlu0 %111 }
  0x7d   :  { %vm114_vm3 = vcmp.eq.s32.totalorder %v112_v14, %v104_v7 }
  0x7e   :  { %v130_v15 = vsel %vm114_vm3, %v128_v11, 0.0  ;;  %v146_v16 = vsel %vm114_vm3, %v207_v6, 0.0 }
  0x7f   :  { %v133_v19 = vsel %vm131_vm2, %v130_v15, 0.0  ;;  %v148_v20 = vsel %vm131_vm2, %v146_v16, 0.0 }
  0x80   :  { %v134_v21 = vadd.f32 %v133_v19, %v132_v17  ;;  %v149_v22 = vadd.f32 %v148_v20, %v147_v18 }
  0x82   :  { %v135_v23 = vrot.slane %v134_v21, 4  ;;  %v150_v24 = vrot.slane %v149_v22, 4 }
  0x84   :  { %v136_v25 = vadd.f32 %v135_v23, %v134_v21  ;;  %v151_v26 = vadd.f32 %v150_v24, %v149_v22 }
  0x86   :  { %v137_v27 = vrot.slane %v136_v25, 2  ;;  %v152_v28 = vrot.slane %v151_v26, 2 }
  0x88   :  { %v138_v29 = vadd.f32 %v137_v27, %v136_v25  ;;  %v153_v30 = vadd.f32 %v152_v28, %v151_v26 }
  0x8a   :  { %v139_v31 = vrot.slane %v138_v29, 1  ;;  %v154_v32 = vrot.slane %v153_v30, 1 }
  0x8c   :  { %v155_v35 = vadd.f32 %v154_v32, %v153_v30  ;;  %v140_v36 = vadd.f32 %v139_v31, %v138_v29 }
  0x8e   :  { %v141_v37 = vadd.f32 %v140_v36, %v123_v33  ;;  %v156_v38 = vadd.f32 %v155_v35, %v144_v34 }
  0x90   :  { %143 = vst.msk [vmem:[#allocation2] sm:$0x1] %vm86_vm0, %v141_v37 }
  0x91   :  { %168 = dma.vmem_to_hbm [thread:$0]  %s164_s2, 16, %s166_s26, [#allocation3]   ;;  %157 = vst.msk [vmem:[#allocation4] sm:$0x1] %vm86_vm0, %v156_v38 }
  0x92   :  { %179 = dma.vmem_to_hbm [thread:$0]  %s175_s28, 16, %s177_s5, [#allocation5]  }
  0x93   :  { %256 = dma.done.wait [#allocation3], 16  }
  0x94   :  { %257 = vsyncadd [#allocation3], 4294967280 }
  0x95   :  { %258 = dma.done.wait [#allocation5], 16  }
  0x96   :  { %259 = vsyncadd [#allocation5], 4294967280 }
  0x97   :  { %188 = vsyncpa [#allocation3], 1 }
  0x98   :  { %189 = vsyncpa [#allocation5], 1 }

</bundles_post_ra>
